<compile_context>
chip_gen: v5e
topology: v5e:2x2
jax: 0.10.0
libtpu: 0.0.40
codegen_flags: <defaults>
</compile_context>

<pallas_src>
import jax
import jax.numpy as jnp
from jax.experimental import pallas as pl
from jax.experimental.pallas import tpu as pltpu

NUM_EXPR = 3


def _sympy_kernel(params_ref, x_ref, y_ref, out_ref):
    """Elementwise evaluation of the compiled expression DAG on one tile.

    params_ref : SMEM f32[3] -> [c_three, neg_half (= -(p/q), pre-folded), c_onefive]
    x_ref      : VMEM f32[tb or 1, tn or 1]   (size-1 dims = broadcast axes)
    y_ref      : VMEM f32[tb or 1, tn or 1]
    out_ref    : VMEM (out_dtype)[NUM_EXPR, tb, tn]
    """
    x = x_ref[...]
    y = y_ref[...]

    c_three = params_ref[0]    # sympy.Float(3.0)  -> nn.Parameter
    neg_half = params_ref[1]   # -(Rational(1,2)) -> folded from num/den buffers
    c_onefive = params_ref[2]  # sympy.Float(1.5)  -> nn.Parameter

    tile_shape = out_ref.shape[1:]       # (tb, tn) — broadcast_tensors semantics
    odt = out_ref.dtype

    # Interleave compute and store per expression: the e0 writeback overlaps
    # the exp/mul work of e1, and temporaries don't all stay live at once.

    # expr0 = Add(Mul(Float, x, y), sin(x))
    e0 = c_three * x * y + jnp.sin(x)
    out_ref[0] = jnp.broadcast_to(e0.astype(odt), tile_shape)

    # expr1 = Add(exp(Mul(-1, Rational, Pow(x, 2))), y)
    x2 = x * x                            # shared subexpression (memodict)
    e1 = jnp.exp(neg_half * x2) + y
    out_ref[1] = jnp.broadcast_to(e1.astype(odt), tile_shape)

    # expr2 = Add(Pow(x, 2), Pow(y, 2), Mul(-1, Float))
    e2 = x2 + y * y - c_onefive
    out_ref[2] = jnp.broadcast_to(e2.astype(odt), tile_shape)


def _pick_tile(size, max_tile, quantum):
    """Largest multiple of `quantum` that divides `size` and is <= max_tile."""
    t = min(max_tile, size)
    t -= t % quantum
    while t > quantum and size % t != 0:
        t -= quantum
    return max(t, quantum)


def _vmem_limit_bytes():
    """~70% of this generation's physical VMEM (89 MiB v5e/v6e, 45 MiB v7x)."""
    try:
        capacity = int(pltpu.get_tpu_info().vmem_capacity_bytes)
    except Exception:
        capacity = 64 << 20  # conservative (v7x-sized) fallback
    return int(capacity * 0.70)


def _tile_bytes(shape, tb, tn, itemsize):
    bb = 1 if shape[0] == 1 else tb
    bn = 1 if shape[1] == 1 else tn
    return bb * bn * itemsize


def _fit_tiles(B, N, tile_b, tile_n, x_shape, y_shape, out_itemsize, budget):
    """Shrink requested tiles until the double-buffered footprint fits budget."""
    tb = _pick_tile(B, tile_b, 8)
    tn = _pick_tile(N, tile_n, 128)

    def footprint(tb_, tn_):
        in_bytes = _tile_bytes(x_shape, tb_, tn_, 4) + _tile_bytes(y_shape, tb_, tn_, 4)
        out_bytes = NUM_EXPR * tb_ * tn_ * out_itemsize
        return 2 * (in_bytes + out_bytes)  # double-buffered pipeline

    while footprint(tb, tn) > budget:
        if tb > 8:                                  # keep the lane axis wide
            tb = _pick_tile(B, max(tb // 2, 8), 8)
        elif tn > 128:
            tn = _pick_tile(N, max(tn // 2, 128), 128)
        else:
            break
    return tb, tn, footprint(tb, tn)


def sympy_module_forward(params, x, y, *, tile_b=512, tile_n=2048,
                         out_dtype=jnp.float32, stack_last=False):
    """Pallas equivalent of SymPyModule.forward(x=x, y=y).

    Default output layout is the lane-dense (NUM_EXPR, B, N) slab (N is the
    128-lane axis).  Pass stack_last=True for the exact torch layout
    torch.stack(out, dim=-1) == (B, N, NUM_EXPR); note this costs an extra
    HBM pass and produces a lane dim of 3, so downstream consumers should
    prefer the slab layout.  Pass out_dtype=jnp.bfloat16 to halve output
    traffic (compute stays f32; cast happens at the stores).
    """
    x = x.astype(jnp.float32)
    y = y.astype(jnp.float32)
    assert x.ndim == 2 and y.ndim == 2, "demo wrapper handles 2-D symbol tensors"
    common_shape = jnp.broadcast_shapes(x.shape, y.shape)
    B, N = common_shape
    assert B % 8 == 0 and N % 128 == 0

    out_itemsize = jnp.dtype(out_dtype).itemsize
    vmem_limit = _vmem_limit_bytes()
    tile_budget = int(vmem_limit * 0.85)  # headroom for compiler scratch/spills
    tb, tn, _ = _fit_tiles(B, N, tile_b, tile_n, x.shape, y.shape,
                           out_itemsize, tile_budget)
    gb, gn = B // tb, N // tn

    # --- Grid axis ordering -------------------------------------------------
    # A broadcast input whose block index is constant across the *inner* grid
    # loop is DMA'd only once per outer step (Pallas skips re-fetch when the
    # block index does not change).  Pick the ordering with fewer input bytes.
    def input_fetch_bytes(inner_dim):
        outer_steps = gb if inner_dim == 1 else gn
        inner_steps = gn if inner_dim == 1 else gb
        total = 0
        for shape in (x.shape, y.shape):
            tile_by = _tile_bytes(shape, tb, tn, 4)
            fetches = outer_steps if shape[inner_dim] == 1 else outer_steps * inner_steps
            total += fetches * tile_by
        return total

    inner_dim = 1 if input_fetch_bytes(1) <= input_fetch_bytes(0) else 0

    def symbol_spec(shape):
        bb = 1 if shape[0] == 1 else tb
        bn = 1 if shape[1] == 1 else tn
        if inner_dim == 1:   # grid = (B-tiles, N-tiles); args (i, j)
            index_map = lambda i, j, s=shape: (0 if s[0] == 1 else i,
                                               0 if s[1] == 1 else j)
        else:                # grid = (N-tiles, B-tiles); args (j, i)
            index_map = lambda j, i, s=shape: (0 if s[0] == 1 else i,
                                               0 if s[1] == 1 else j)
        return pl.BlockSpec((bb, bn), index_map)

    if inner_dim == 1:
        grid = (gb, gn)
        out_spec = pl.BlockSpec((NUM_EXPR, tb, tn), lambda i, j: (0, i, j))
    else:
        grid = (gn, gb)
        out_spec = pl.BlockSpec((NUM_EXPR, tb, tn), lambda j, i: (0, i, j))

    # Hoist scalar constant folding out of the per-tile body:
    #   c_three = Float(3.0), neg_half = -(p/q) from the Rational buffers,
    #   c_onefive = Float(1.5).
    folded_params = jnp.stack(
        [params[0], -(params[1] / params[2]), params[3]]
    ).astype(jnp.float32)

    out = pl.pallas_call(
        _sympy_kernel,
        out_shape=jax.ShapeDtypeStruct((NUM_EXPR, B, N), out_dtype),
        grid_spec=pltpu.PrefetchScalarGridSpec(
            num_scalar_prefetch=0,
            grid=grid,
            in_specs=[
                pl.BlockSpec(memory_space=pltpu.MemorySpace.SMEM),  # folded params
                symbol_spec(x.shape),                               # x tile
                symbol_spec(y.shape),                               # y tile
            ],
            out_specs=out_spec,
        ),
        compiler_params=pltpu.CompilerParams(
            # Both axes are independent -> v7x's 2 TensorCores shard the grid.
            dimension_semantics=("parallel", "parallel"),
            vmem_limit_bytes=vmem_limit,
        ),
    )(folded_params, x, y)

    if stack_last:
        # Exact torch.stack(dim=-1) layout; costs an extra HBM pass.
        return jnp.transpose(out, (1, 2, 0))
    return out


def sympy_module_reference(params, x, y, *, stack_last=False):
    """Pure-JAX reference matching the torch forward exactly (f32)."""
    common = jnp.broadcast_shapes(x.shape, y.shape)
    xb = jnp.broadcast_to(x, common).astype(jnp.float32)
    yb = jnp.broadcast_to(y, common).astype(jnp.float32)
    c3, p, q, c15 = params[0], params[1], params[2], params[3]
    half = p / q
    e0 = c3 * xb * yb + jnp.sin(xb)
    e1 = jnp.exp(-half * xb * xb) + yb
    e2 = xb * xb + yb * yb - c15
    axis = -1 if stack_last else 0
    return jnp.stack([e0, e1, e2], axis=axis)


if __name__ == "__main__":
    key = jax.random.PRNGKey(0)
    kx, ky = jax.random.split(key)

    # Small demo shapes; y is genuinely broadcast along B to exercise the
    # broadcast-via-BlockSpec path (no materialized broadcast_to in HBM).
    B, N = 16, 256
    x = jax.random.normal(kx, (B, N), dtype=jnp.float32)
    y = jax.random.normal(ky, (1, N), dtype=jnp.float32)

    # "Parameters": Float(3.0), Rational(1, 2) as (p, q) buffers, Float(1.5).
    params = jnp.array([3.0, 1.0, 2.0, 1.5], dtype=jnp.float32)

    ref = sympy_module_reference(params, x, y)

    # Canonical lane-dense slab output (NUM_EXPR, B, N), f32 (torch parity).
    out = jax.block_until_ready(sympy_module_forward(params, x, y))
    assert out.shape == (NUM_EXPR, B, N), out.shape
    assert jnp.allclose(out, ref, atol=1e-5, rtol=1e-5), "slab mismatch vs reference"

    # bf16-output variant (halves output HBM traffic; compute stays f32).
    out_bf16 = jax.block_until_ready(
        sympy_module_forward(params, x, y, out_dtype=jnp.bfloat16))
    assert out_bf16.dtype == jnp.bfloat16
    assert jnp.allclose(out_bf16.astype(jnp.float32), ref, atol=5e-2, rtol=2e-2), \
        "bf16 slab mismatch vs reference"

    # Optional exact torch.stack(dim=-1) layout for semantic parity check.
    out_t = jax.block_until_ready(sympy_module_forward(params, x, y, stack_last=True))
    ref_t = sympy_module_reference(params, x, y, stack_last=True)
    assert out_t.shape == (B, N, NUM_EXPR), out_t.shape
    assert jnp.allclose(out_t, ref_t, atol=1e-5, rtol=1e-5), "stacked mismatch vs reference"

    print("KERNEL_OK")
</pallas_src>

<mosaic_0001>
module attributes {stable_mosaic.version = 11 : i64} {
  func.func @_sympy_kernel(%arg0: i32, %arg1: i32, %arg2: memref<3xf32, #tpu.memory_space<smem>>, %arg3: memref<16x256xf32, #tpu.memory_space<vmem>>, %arg4: memref<1x256xf32, #tpu.memory_space<vmem>>, %arg5: memref<3x16x256xf32, #tpu.memory_space<vmem>>) attributes {dimension_semantics = [#tpu.dimension_semantics<parallel>, #tpu.dimension_semantics<parallel>], iteration_bounds = array<i64: 1, 1>, scalar_prefetch = 0 : i64, scratch_operands = 0 : i64, tpu.core_type = #tpu.core_type<tc>, window_params = [{transform_indices = @transform_0, window_bounds = array<i64: 3>}, {transform_indices = @transform_1, window_bounds = array<i64: 16, 256>}, {transform_indices = @transform_2, window_bounds = array<i64: 1, 256>}, {transform_indices = @transform_3, window_bounds = array<i64: 3, 16, 256>}]} {
    %c0 = arith.constant 0 : index
    %c0_0 = arith.constant 0 : index
    %0 = vector.load %arg3[%c0, %c0_0] : memref<16x256xf32, #tpu.memory_space<vmem>>, vector<16x256xf32>
    %c0_1 = arith.constant 0 : index
    %c0_2 = arith.constant 0 : index
    %1 = vector.load %arg4[%c0_1, %c0_2] : memref<1x256xf32, #tpu.memory_space<vmem>>, vector<1x256xf32>
    %c0_3 = arith.constant 0 : index
    %2 = memref.load %arg2[%c0_3] : memref<3xf32, #tpu.memory_space<smem>>
    %c1 = arith.constant 1 : index
    %3 = memref.load %arg2[%c1] : memref<3xf32, #tpu.memory_space<smem>>
    %c2 = arith.constant 2 : index
    %4 = memref.load %arg2[%c2] : memref<3xf32, #tpu.memory_space<smem>>
    %5 = vector.broadcast %2 : f32 to vector<16x256xf32>
    %6 = arith.mulf %5, %0 : vector<16x256xf32>
    %7 = vector.broadcast %1 : vector<1x256xf32> to vector<16x256xf32>
    %8 = arith.mulf %6, %7 : vector<16x256xf32>
    %9 = math.sin %0 : vector<16x256xf32>
    %10 = arith.addf %8, %9 : vector<16x256xf32>
    %c0_4 = arith.constant 0 : index
    %c0_5 = arith.constant 0 : index
    %c0_6 = arith.constant 0 : index
    %11 = vector.load %arg5[%c0_4, %c0_5, %c0_6] : memref<3x16x256xf32, #tpu.memory_space<vmem>>, vector<1x16x256xf32>
    %12 = vector.shape_cast %11 : vector<1x16x256xf32> to vector<16x256xf32>
    %13 = vector.shape_cast %10 : vector<16x256xf32> to vector<1x16x256xf32>
    tpu.vector_store %arg5[%c0_4, %c0_5, %c0_6], %13 {strides = array<i32>} : memref<3x16x256xf32, #tpu.memory_space<vmem>>, vector<1x16x256xf32>,
    %14 = arith.mulf %0, %0 : vector<16x256xf32>
    %15 = vector.broadcast %3 : f32 to vector<16x256xf32>
    %16 = arith.mulf %15, %14 : vector<16x256xf32>
    %17 = math.exp %16 : vector<16x256xf32>
    %18 = vector.broadcast %1 : vector<1x256xf32> to vector<16x256xf32>
    %19 = arith.addf %17, %18 : vector<16x256xf32>
    %c1_7 = arith.constant 1 : index
    %c0_8 = arith.constant 0 : index
    %c0_9 = arith.constant 0 : index
    %20 = vector.load %arg5[%c1_7, %c0_8, %c0_9] : memref<3x16x256xf32, #tpu.memory_space<vmem>>, vector<1x16x256xf32>
    %21 = vector.shape_cast %20 : vector<1x16x256xf32> to vector<16x256xf32>
    %22 = vector.shape_cast %19 : vector<16x256xf32> to vector<1x16x256xf32>
    tpu.vector_store %arg5[%c1_7, %c0_8, %c0_9], %22 {strides = array<i32>} : memref<3x16x256xf32, #tpu.memory_space<vmem>>, vector<1x16x256xf32>,
    %23 = arith.mulf %1, %1 : vector<1x256xf32>
    %24 = vector.broadcast %23 : vector<1x256xf32> to vector<16x256xf32>
    %25 = arith.addf %14, %24 : vector<16x256xf32>
    %26 = vector.broadcast %4 : f32 to vector<16x256xf32>
    %27 = arith.subf %25, %26 : vector<16x256xf32>
    %c2_10 = arith.constant 2 : index
    %c0_11 = arith.constant 0 : index
    %c0_12 = arith.constant 0 : index
    %28 = vector.load %arg5[%c2_10, %c0_11, %c0_12] : memref<3x16x256xf32, #tpu.memory_space<vmem>>, vector<1x16x256xf32>
    %29 = vector.shape_cast %28 : vector<1x16x256xf32> to vector<16x256xf32>
    %30 = vector.shape_cast %27 : vector<16x256xf32> to vector<1x16x256xf32>
    tpu.vector_store %arg5[%c2_10, %c0_11, %c0_12], %30 {strides = array<i32>} : memref<3x16x256xf32, #tpu.memory_space<vmem>>, vector<1x16x256xf32>,
    return
  }
  func.func @transform_0(%arg0: i32, %arg1: i32) -> i32 {
    %c0_i32 = arith.constant 0 : i32
    %c0_i32_0 = arith.constant 0 : i32
    return %c0_i32 : i32
  }
  func.func @transform_1(%arg0: i32, %arg1: i32) -> (i32, i32) {
    %c0_i32 = arith.constant 0 : i32
    return %arg0, %arg1 : i32, i32
  }
  func.func @transform_2(%arg0: i32, %arg1: i32) -> (i32, i32) {
    %c0_i32 = arith.constant 0 : i32
    %c0_i32_0 = arith.constant 0 : i32
    return %c0_i32, %arg1 : i32, i32
  }
  func.func @transform_3(%arg0: i32, %arg1: i32) -> (i32, i32, i32) {
    %c0_i32 = arith.constant 0 : i32
    %c0_i32_0 = arith.constant 0 : i32
    return %c0_i32, %arg0, %arg1 : i32, i32, i32
  }
}

</mosaic_0001>

<bundles_post_ra>
// kernel: tpu_custom_call.1
= control target key start
LH: loop header
LB: loop body
LE: loop exit
PB: predicated region body
PF: predicated region fallthrough
CT: control target
= control target key end

     0   :  { %8 = vsyncpa [#allocation5], 0  ;;  %s1406_s0 = inlined_call_operand.hbm [shape: f32[3], index: 0, kind: input, shape index: {}]   ;;  %s1407_s1 = inlined_call_operand.hbm [shape: f32[16,256], index: 1, kind: input, shape index: {}]   ;;  %s1408_s2 = inlined_call_operand.hbm [shape: f32[1,256], index: 2, kind: input, shape index: {}]   ;;  %s1409_s3 = inlined_call_operand.hbm [shape: f32[3,16,256], index: 3, kind: output, shape index: {}]  }
   0x1   :  { %9 = vsyncpa [#allocation3], 0 }
   0x2   :  { %10 = vsyncpa [#allocation8], 0 }
   0x3   :  { %11 = vsyncpa [#allocation4], 0  ;;  %s17_s14 = sshll.u32 %s1406_s0, 4  ;;  %s25_s17 = sshll.u32 %s1407_s1, 4  ;;  %s18_s14 = int_to_ptr.hbm [resolvable:$true] %s17_s14  ;;  %s26_s17 = int_to_ptr.hbm [resolvable:$true] %s25_s17 }
   0x4   :  { %s905_s18 = smov [#allocation2]   ;;  %s906_s19 = smov [#allocation6]  }
   0x5   :  { %20 = dma.hbm_to_smem %s18_s14, 16, %s905_s18, [#allocation5]  }
   0x6   :  { %s27_s20 = sshll.u32 %s906_s19, 4  ;;  %s907_s21 = smov 256   ;;  %s28_s20 = int_to_ptr.vmem [resolvable:$true] %s27_s20 }
   0x7   :  { %s908_s22 = smov 16   ;;  %s39_s0 = sshll.u32 %s1408_s2, 4  ;;  %s40_s0 = int_to_ptr.hbm [resolvable:$true] %s39_s0 }
   0x8   :  { %33 = dma.hbm_to_vmem [thread:$0]  %s26_s17, 512, %s28_s20, [#allocation3], %s907_s21, %s907_s21, %s908_s22  }
   0x9   :  { %s909_s25 = smov [#allocation7]  }
   0xa   :  { %s41_s26 = sshll.u32 %s909_s25, 4  ;;  %s42_s26 = int_to_ptr.vmem [resolvable:$true] %s41_s26 }
   0xb   :  { %44 = dma.hbm_to_vmem [thread:$0]  %s40_s0, 32, %s42_s26, [#allocation8]  }
   0xc   :  { %897 = dma.done.wait [#allocation5], 16  }
   0xd   :  { %898 = vsyncadd [#allocation5], 4294967280 }
   0xe   :  { %899 = dma.done.wait [#allocation3], 512  }
   0xf   :  { %900 = vsyncadd [#allocation3], 4294966784 }
  0x10   :  { %901 = dma.done.wait [#allocation8], 32  }
  0x11   :  { %902 = vsyncadd [#allocation8], 4294967264 }
  0x12   :  { %57 = sfence }
  0x13   :  { %v950_v0 = vld [vmem:[#allocation6] sm:$0xff]  ;;  %v954_v3 = vld [vmem:[#allocation6 + $0x8] sm:$0xff]  ;;  %v960_v11 = vld [vmem:[#allocation6 + $0x10] sm:$0xff]  ;;  %v910_v25 = vmov 683565275   ;;  %s63_s1 = sld [smem:[#allocation2]] }
  0x14   :  { %v80_v1 = vand.u32 2147483647, %v950_v0  ;;  %v83_v2 = vand.u32 2139095040, %v950_v0  ;;  %v238_v6 = vand.u32 2139095040, %v954_v3  ;;  %v235_v9 = vand.u32 2147483647, %v954_v3 }
  0x15   :  { %v393_v16 = vand.u32 2139095040, %v960_v11  ;;  %v911_v27 = vmov 2475754826   ;;  %v912_v29 = vmov 2131351028   ;;  %s775_s2 = sld [smem:[#allocation2 + $0x1]] }
  0x16   :  { %v84_v4 = vshrl.u32 %v83_v2, 23  ;;  %v87_v5 = vand.u32 8388607, %v80_v1  ;;  %v239_v10 = vshrl.u32 %v238_v6, 23  ;;  %v242_v15 = vand.u32 8388607, %v235_v9 }
  0x17   :  { %v970_v23 = vshrl.u32 %v393_v16, 23  ;;  %v913_v31 = vmov 2102212464   ;;  %v914_v33 = vmov 920167782   ;;  %s776_s27 = sld [smem:[#allocation2 + $0x2]] }
  0x18   :  { %v777_v7 = vadd.s32 4294967169, %v84_v4  ;;  %v88_v8 = vor.u32 8388608, %v87_v5  ;;  %v780_v13 = vadd.s32 4294967169, %v239_v10  ;;  %v243_v22 = vor.u32 8388608, %v242_v15  ;;  %s917_s28 = smov [#allocation9]   ;;  %s760_s5 = sshll.u32 %s1409_s3, 4  ;;  %s761_s5 = int_to_ptr.hbm [resolvable:$true] %s760_s5 }
  0x19   :  { %v915_v40 = vmov 1326507024   ;;  %s758_s29 = sshll.u32 %s917_s28, 4  ;;  %s759_s29 = int_to_ptr.vmem [resolvable:$true] %s758_s29 }
  0x1a   :  { %v90_v12 = vadd.s32 1, %v777_v7  ;;  %v962_v14 = vshll.u32 %v88_v8, 8  ;;  %v245_v18 = vadd.s32 1, %v780_v13  ;;  %v992_v60 = vshll.u32 %v243_v22, 8 }
  0x1c   :  { %vm91_vm0 = vcmp.gt.s32.totalorder %v90_v12, 0  ;;  %v968_v21 = vand.u32 65535, %v962_v14  ;;  %vm246_vm2 = vcmp.gt.s32.totalorder %v245_v18, 0  ;;  %v130_v59 = vshrl.u32 %v962_v14, 16 }
  0x1d   :  { %v92_v17 = vsel %vm91_vm0, %v90_v12, 0  ;;  %v247_v45 = vsel %vm246_vm2, %v245_v18, 0 }
  0x1e   :  { %v93_v19 = vshrl.u32 %v92_v17, 5  ;;  %v94_v20 = vand.u32 31, %v92_v17  ;;  %v983_v48 = vand.u32 31, %v247_v45  ;;  %v999_v2 = vshrl.u32 %v247_v45, 5 }
  0x20   :  { %v95_v24 = vsub.s32 32, %v94_v20  ;;  %v97_v26 = vshll.u32 %v910_v25, %v94_v20  ;;  %v100_v28 = vshll.u32 %v911_v27, %v94_v20  ;;  %v103_v30 = vshll.u32 %v912_v29, %v94_v20 }
  0x21   :  { %v106_v32 = vshll.u32 %v913_v31, %v94_v20  ;;  %v109_v34 = vshll.u32 %v914_v33, %v94_v20  ;;  %vm112_vm1 = vcmp.lt.s32.totalorder %v93_v19, 1  ;;  %vm113_vm3 = vcmp.lt.s32.totalorder %v93_v19, 2 }
  0x22   :  { %v96_v35 = vshrl.u32 %v910_v25, %v95_v24  ;;  %v98_v36 = vshrl.u32 %v911_v27, %v95_v24  ;;  %v101_v37 = vshrl.u32 %v912_v29, %v95_v24  ;;  %v104_v38 = vshrl.u32 %v913_v31, %v95_v24 }
  0x23   :  { %v107_v39 = vshrl.u32 %v914_v33, %v95_v24  ;;  %v110_v41 = vshrl.u32 %v915_v40, %v95_v24  ;;  %vm115_vm4 = vcmp.lt.s32.totalorder %v93_v19, 4  ;;  %vm114_vm5 = vcmp.lt.s32.totalorder %v93_v19, 3 }
  0x24   :  { %v99_v42 = vor.u32 %v98_v36, %v97_v26  ;;  %v102_v43 = vor.u32 %v101_v37, %v100_v28  ;;  %v105_v44 = vor.u32 %v104_v38, %v103_v30  ;;  %v989_v56 = vsub.s32 32, %v983_v48 }
  0x25   :  { %v108_v46 = vor.u32 %v107_v39, %v106_v32  ;;  %v111_v47 = vor.u32 %v110_v41, %v109_v34  ;;  %v252_v8 = vshll.u32 %v910_v25, %v983_v48  ;;  %v255_v12 = vshll.u32 %v911_v27, %v983_v48 }
  0x26   :  { %v116_v49 = vsel %vm112_vm1, %v96_v35, %v99_v42  ;;  %v117_v50 = vsel %vm115_vm4, %v105_v44, 2102212464  ;;  %v120_v51 = vsel %vm112_vm1, %v99_v42, %v102_v43  ;;  %v124_v52 = vsel %vm112_vm1, %v102_v43, %v105_v44 }
  0x27   :  { %v118_v53 = vsel %vm114_vm5, %v102_v43, %v117_v50  ;;  %v121_v54 = vsel %vm115_vm4, %v108_v46, 920167782  ;;  %v125_v55 = vsel %vm115_vm4, %v111_v47, 1326507024  ;;  %v253_v10 = vshrl.u32 %v911_v27, %v989_v56 }
  0x28   :  { %v122_v57 = vsel %vm114_vm5, %v105_v44, %v121_v54  ;;  %v126_v58 = vsel %vm114_vm5, %v108_v46, %v125_v55  ;;  %v995_v61 = vsel %vm113_vm3, %v116_v49, %v118_v53  ;;  %v256_v13 = vshrl.u32 %v912_v29, %v989_v56 }
  0x29   :  { %v123_v62 = vsel %vm113_vm3, %v120_v51, %v122_v57  ;;  %v127_v63 = vsel %vm113_vm3, %v124_v52, %v126_v58  ;;  %v258_v18 = vshll.u32 %v912_v29, %v983_v48  ;;  %v254_v41 = vor.u32 %v253_v10, %v252_v8 }
  0x2a   :  { %v131_v4 = vand.u32 65535, %v127_v63  ;;  %v132_v5 = vshrl.u32 %v127_v63, 16  ;;  %v153_v6 = vand.u32 65535, %v123_v62  ;;  %v154_v7 = vshrl.u32 %v123_v62, 16 }
  0x2b   :  { %v916_v42 = vmov 0   ;;  %v261_v47 = vshll.u32 %v913_v31, %v983_v48  ;;  %v1022_v51 = vor.u32 %v256_v13, %v255_v12  ;;  %v262_v55 = vshrl.u32 %v914_v33, %v989_v56 }
  0x2c   :  { %v133_v15 = vmul.u32 %v131_v4, %v968_v21  ;;  %v134_v16 = vmul.u32 %v132_v5, %v968_v21  ;;  %v135_v17 = vmul.u32 %v131_v4, %v130_v59  ;;  %v136_v19 = vmul.u32 %v132_v5, %v130_v59 }
  0x2d   :  { %v155_v20 = vmul.u32 %v153_v6, %v968_v21  ;;  %v156_v22 = vmul.u32 %v154_v7, %v968_v21  ;;  %v157_v24 = vmul.u32 %v153_v6, %v130_v59  ;;  %v158_v32 = vmul.u32 %v154_v7, %v130_v59 }
  0x2e   :  { %v137_v26 = vshll.u32 %v134_v16, 16  ;;  %v138_v28 = vshrl.u32 %v134_v16, 16  ;;  %v139_v30 = vshll.u32 %v135_v17, 16  ;;  %v140_v34 = vshrl.u32 %v135_v17, 16 }
  0x2f   :  { %v159_v35 = vshll.u32 %v156_v22, 16  ;;  %v160_v36 = vshrl.u32 %v156_v22, 16  ;;  %v161_v37 = vshll.u32 %v157_v24, 16  ;;  %v162_v39 = vshrl.u32 %v157_v24, 16 }
  0x30   :  { %vm141_vm6 = vc.u32 %v133_v15, %v137_v26  ;;  %v143_v38 = vadd.s32 %v137_v26, %v133_v15  ;;  %v259_v21 = vshrl.u32 %v913_v31, %v989_v56  ;;  %v264_v58 = vshll.u32 %v914_v33, %v983_v48 }
  0x31   :  { %v142_v43 = vsel %vm141_vm6, 1, %v916_v42  ;;  %vm163_vm7 = vc.u32 %v155_v20, %v159_v35  ;;  %v165_v44 = vadd.s32 %v159_v35, %v155_v20  ;;  %v265_v59 = vshrl.u32 %v915_v40, %v989_v56 }
  0x32   :  { %v144_v45 = vadd.s32 %v142_v43, %v136_v19  ;;  %vm145_vm8 = vc.u32 %v143_v38, %v139_v30  ;;  %v164_v46 = vsel %vm163_vm7, 1, %v916_v42  ;;  %v260_v54 = vor.u32 %v259_v21, %v258_v18 }
  0x33   :  { %v146_v49 = vsel %vm145_vm8, 1, %v916_v42  ;;  %v166_v50 = vadd.s32 %v164_v46, %v158_v32  ;;  %vm167_vm9 = vc.u32 %v165_v44, %v161_v37  ;;  %vm267_vm10 = vcmp.lt.s32.totalorder %v999_v2, 1 }
  0x34   :  { %v148_v52 = vadd.s32 %v146_v49, %v144_v45  ;;  %v168_v53 = vsel %vm167_vm9, 1, %v916_v42  ;;  %v1032_v63 = vadd.s32 %v165_v44, %v161_v37  ;;  %v263_v4 = vor.u32 %v262_v55, %v261_v47 }
  0x35   :  { %v170_v57 = vadd.s32 %v168_v53, %v166_v50  ;;  %vm269_vm11 = vcmp.lt.s32.totalorder %v999_v2, 3  ;;  %v266_v6 = vor.u32 %v265_v59, %v264_v58  ;;  %vm268_vm12 = vcmp.lt.s32.totalorder %v999_v2, 2 }
  0x36   :  { %v149_v62 = vadd.s32 %v148_v52, %v138_v28  ;;  %vm270_vm13 = vcmp.lt.s32.totalorder %v999_v2, 4  ;;  %v275_v48 = vsel %vm267_vm10, %v254_v41, %v1022_v51  ;;  %v783_v13 = vadd.s32 4294967169, %v970_v23 }
  0x37   :  { %v171_v5 = vadd.s32 %v170_v57, %v160_v36  ;;  %v276_v8 = vsel %vm270_vm13, %v263_v4, 920167782  ;;  %v173_v15 = vmul.u32 %v962_v14, %v995_v61  ;;  %v279_v17 = vsel %vm267_vm10, %v1022_v51, %v260_v54 }
  0x38   :  { %v1037_v7 = vadd.s32 %v149_v62, %v140_v34  ;;  %v277_v12 = vsel %vm269_vm11, %v260_v54, %v276_v8  ;;  %v280_v19 = vsel %vm270_vm13, %v266_v6, 1326507024  ;;  %v284_v20 = vand.u32 65535, %v992_v60 }
  0x39   :  { %v172_v10 = vadd.s32 %v171_v5, %v162_v39  ;;  %v278_v16 = vsel %vm268_vm12, %v275_v48, %v277_v12  ;;  %v285_v23 = vshrl.u32 %v992_v60, 16  ;;  %v281_v14 = vsel %vm269_vm11, %v263_v4, %v280_v19 }
  0x3a   :  { %vm175_vm14 = vc.u32 %v1037_v7, %v1032_v63  ;;  %v308_v61 = vand.u32 65535, %v278_v16  ;;  %v309_v22 = vshrl.u32 %v278_v16, 16  ;;  %v251_v26 = vshrl.u32 %v910_v25, %v989_v56 }
  0x3b   :  { %v176_v18 = vadd.s32 1, %v172_v10  ;;  %v282_v28 = vsel %vm268_vm12, %v279_v17, %v281_v14  ;;  %v400_v38 = vadd.s32 1, %v783_v13  ;;  %v390_v56 = vand.u32 2147483647, %v960_v11 }
  0x3c   :  { %v286_v32 = vand.u32 65535, %v282_v28  ;;  %v287_v34 = vshrl.u32 %v282_v28, 16  ;;  %v310_v35 = vmul.u32 %v308_v61, %v284_v20  ;;  %v311_v36 = vmul.u32 %v309_v22, %v284_v20 }
  0x3d   :  { %v177_v24 = vsel %vm175_vm14, %v176_v18, %v172_v10  ;;  %v312_v37 = vmul.u32 %v308_v61, %v285_v23  ;;  %v271_v45 = vsel %vm267_vm10, %v251_v26, %v254_v41  ;;  %v272_v53 = vsel %vm270_vm13, %v260_v54, 2102212464 }
  0x3e   :  { %v178_v30 = vadd.s32 %v177_v24, %v173_v15  ;;  %v288_v43 = vmul.u32 %v286_v32, %v284_v20  ;;  %v289_v44 = vmul.u32 %v287_v34, %v284_v20  ;;  %v290_v21 = vmul.u32 %v286_v32, %v285_v23 }
  0x3f   :  { %v314_v46 = vshll.u32 %v311_v36, 16  ;;  %v291_v49 = vmul.u32 %v287_v34, %v285_v23  ;;  %v313_v55 = vmul.u32 %v309_v22, %v285_v23  ;;  %v316_v57 = vshll.u32 %v312_v37, 16 }
  0x40   :  { %v179_v39 = vadd.s32 536870912, %v178_v30  ;;  %v292_v50 = vshll.u32 %v289_v44, 16  ;;  %v294_v52 = vshll.u32 %v290_v21, 16  ;;  %vm401_vm1 = vcmp.gt.s32.totalorder %v400_v38, 0 }
  0x41   :  { %vm318_vm15 = vc.u32 %v310_v35, %v314_v46  ;;  %v315_v62 = vshrl.u32 %v311_v36, 16  ;;  %v320_v5 = vadd.s32 %v314_v46, %v310_v35  ;;  %v293_v48 = vshrl.u32 %v289_v44, 16 }
  0x42   :  { %v1069_v47 = vshrl.u32 %v179_v39, 30  ;;  %vm296_vm0 = vc.u32 %v288_v43, %v292_v50  ;;  %v298_v59 = vadd.s32 %v292_v50, %v288_v43  ;;  %v319_v4 = vsel %vm318_vm15, 1, %v916_v42 }
  0x43   :  { %v297_v41 = vsel %vm296_vm0, 1, %v916_v42  ;;  %v295_v54 = vshrl.u32 %v290_v21, 16  ;;  %v321_v12 = vadd.s32 %v319_v4, %v313_v55  ;;  %vm322_vm3 = vc.u32 %v320_v5, %v316_v57 }
  0x44   :  { %v181_v58 = vshll.u32 %v1069_v47, 30  ;;  %v299_v8 = vadd.s32 %v297_v41, %v291_v49  ;;  %vm300_vm2 = vc.u32 %v298_v59, %v294_v52  ;;  %v323_v16 = vsel %vm322_vm3, 1, %v916_v42 }
  0x45   :  { %v301_v10 = vsel %vm300_vm2, 1, %v916_v42  ;;  %v273_v17 = vsel %vm269_vm11, %v1022_v51, %v272_v53  ;;  %v317_v18 = vshrl.u32 %v312_v37, 16  ;;  %v325_v19 = vadd.s32 %v323_v16, %v321_v12  ;;  %v1090_v51 = vld [vmem:[#allocation7] sm:$0x3] }
  0x46   :  { %v182_v6 = vsub.s32 %v178_v30, %v181_v58  ;;  %v303_v15 = vadd.s32 %v301_v10, %v299_v8  ;;  %v402_v20 = vsel %vm401_vm1, %v400_v38, 0  ;;  %v1082_v61 = vadd.s32 %v320_v5, %v316_v57 }
  0x47   :  { %v397_v22 = vand.u32 8388607, %v390_v56  ;;  %v326_v26 = vadd.s32 %v325_v19, %v315_v62  ;;  %v274_v28 = vsel %vm268_vm12, %v271_v45, %v273_v17  ;;  %v404_v32 = vand.u32 31, %v402_v20 }
  0x48   :  { %vm183_vm4 = vcmp.lt.s32.totalorder %v182_v6, 0  ;;  %v184_v13 = vsub.s32 0, %v182_v6  ;;  %v304_v14 = vadd.s32 %v303_v15, %v293_v48  ;;  %v1092_v36 = vstv %s63_s1 }
  0x49   :  { %v327_v35 = vadd.s32 %v326_v26, %v317_v18  ;;  %v1095_v37 = vperm.slane %v1090_v51, 0  ;;  %v398_v38 = vor.u32 8388608, %v397_v22  ;;  %v174_v2 = vadd.s32 %v1032_v63, %v1037_v7 }
  0x4a   :  { %v185_v23 = vsel %vm183_vm4, %v184_v13, %v182_v6  ;;  %v1088_v30 = vadd.s32 %v304_v14, %v295_v54  ;;  %v328_v39 = vmul.u32 %v992_v60, %v274_v28  ;;  %vm82_vm7 = vcmp.lt.s32.totalorder %v950_v0, 0 }
  0x4b   :  { %v186_v24 = vclz %v185_v23  ;;  %v331_v43 = vadd.s32 1, %v327_v35  ;;  %v204_v21 = vsub.s32 4, %v1069_v47  ;;  %v405_v45 = vsub.s32 32, %v404_v32 }
  0x4c   :  { %vm330_vm5 = vc.u32 %v1088_v30, %v1082_v61  ;;  %vm1106_vm8 = vcmp.le.f32.partialorder %v80_v1, 0.7853982  ;;  %v67_v60 = vmul.f32 %v1092_v36, %v950_v0  ;;  %v1112_v7 = vshrl.u32 %v402_v20, 5 }
  0x4d   :  { %v778_v34 = vadd.s32 4294967294, %v186_v24  ;;  %v332_v63 = vsel %vm330_vm5, %v331_v43, %v327_v35  ;;  %v410_v53 = vshll.u32 %v911_v27, %v404_v32  ;;  %v1115_v55 = vshll.u32 %v398_v38, 8 }
  0x4e   :  { %v333_v59 = vadd.s32 %v332_v63, %v328_v39  ;;  %v416_v1 = vshll.u32 %v913_v31, %v404_v32  ;;  %v411_v41 = vshrl.u32 %v912_v29, %v405_v45  ;;  %v413_v62 = vshll.u32 %v912_v29, %v404_v32 }
  0x4f   :  { %vm779_vm6 = vcmp.lt.s32.totalorder %v778_v34, 0  ;;  %v414_v4 = vshrl.u32 %v913_v31, %v405_v45  ;;  %v417_v5 = vshrl.u32 %v914_v33, %v405_v45  ;;  %v205_v8 = vsel %vm82_vm7, %v204_v21, %v1069_v47 }
  0x50   :  { %v189_v44 = vsel %vm779_vm6, 0, %v778_v34  ;;  %v334_v54 = vadd.s32 536870912, %v333_v59  ;;  %v407_v10 = vshll.u32 %v910_v25, %v404_v32  ;;  %v408_v12 = vshrl.u32 %v911_v27, %v405_v45 }
  0x51   :  { %v190_v49 = vsub.s32 32, %v189_v44  ;;  %v191_v50 = vshll.u32 %v182_v6, %v189_v44  ;;  %v194_v52 = vsub.s32 4294967266, %v189_v44  ;;  %v419_v13 = vshll.u32 %v914_v33, %v404_v32 }
  0x52   :  { %v420_v15 = vshrl.u32 %v915_v40, %v405_v45  ;;  %v1129_v18 = vshrl.u32 %v334_v54, 30  ;;  %v418_v19 = vor.u32 %v417_v5, %v416_v1  ;;  %v412_v20 = vor.u32 %v411_v41, %v410_v53 }
  0x53   :  { %v192_v57 = vshrl.u32 %v174_v2, %v190_v49  ;;  %v195_v58 = vadd.s32 127, %v194_v52  ;;  %v415_v23 = vor.u32 %v414_v4, %v413_v62  ;;  %vm425_vm9 = vcmp.lt.s32.totalorder %v1112_v7, 4 }
  0x54   :  { %v421_v14 = vor.u32 %v420_v15, %v419_v13  ;;  %v1133_v47 = vmul.f32 %v1095_v37, %v67_v60  ;;  %v336_v24 = vshll.u32 %v1129_v18, 30  ;;  %vm422_vm10 = vcmp.lt.s32.totalorder %v1112_v7, 1 }
  0x55   :  { %v193_v6 = vor.u32 %v192_v57, %v191_v50  ;;  %v196_v48 = vshll.u32 %v195_v58, 23  ;;  %v207_v26 = vsel %vm1106_vm8, 0, %v205_v8  ;;  %v409_v28 = vor.u32 %v408_v12, %v407_v10 }
  0x56   :  { %v439_v32 = vand.u32 65535, %v1115_v55  ;;  %v1141_v34 = vshrl.u32 %v1115_v55, 16  ;;  %v1143_v38 = vsub.s32 %v333_v59, %v336_v24  ;;  %vm424_vm11 = vcmp.lt.s32.totalorder %v1112_v7, 3 }
  0x57   :  { %v197_v16 = vor.u32 4788187, %v196_v48  ;;  %v200_v17 = vcvt.s32.f32 %v193_v6  ;;  %v431_v2 = vsel %vm425_vm9, %v418_v19, 920167782  ;;  %v406_v39 = vshrl.u32 %v910_v25, %v405_v45 }
  0x58   :  { %vm423_vm12 = vcmp.lt.s32.totalorder %v1112_v7, 2  ;;  %v434_v43 = vsel %vm422_vm10, %v412_v20, %v415_v23  ;;  %v435_v44 = vsel %vm425_vm9, %v421_v14, 1326507024  ;;  %v224_v49 = vadd.s32 3, %v207_v26 }
  0x59   :  { %v198_v22 = vand.u32 2147483647, %v197_v16  ;;  %vm237_vm13 = vcmp.lt.s32.totalorder %v954_v3, 0  ;;  %vm338_vm14 = vcmp.lt.s32.totalorder %v1143_v38, 0  ;;  %v339_v50 = vsub.s32 0, %v1143_v38 }
  0x5a   :  { %v329_v52 = vadd.s32 %v1082_v61, %v1088_v30  ;;  %v430_v45 = vsel %vm422_vm10, %v409_v28, %v412_v20  ;;  %v432_v63 = vsel %vm424_vm11, %v415_v23, %v431_v2  ;;  %v436_v60 = vsel %vm424_vm11, %v418_v19, %v435_v44 }
  0x5b   :  { %v201_v35 = vmul.f32 %v200_v17, %v198_v22  ;;  %v340_v57 = vsel %vm338_vm14, %v339_v50, %v1143_v38  ;;  %v427_v58 = vsel %vm425_vm9, %v415_v23, 2102212464  ;;  %v437_v61 = vsel %vm423_vm12, %v434_v43, %v436_v60  ;;  %v1201_v23 = vld [vmem:[#allocation6 + $0x18] sm:$0xff] }
  0x5c   :  { %v341_v59 = vclz %v340_v57  ;;  %v441_v1 = vand.u32 65535, %v437_v61  ;;  %v442_v41 = vshrl.u32 %v437_v61, 16  ;;  %v1179_v4 = vand.u32 3, %v224_v49 }
  0x5d   :  { %v202_v21 = vxor.u32 2147483648, %v201_v35  ;;  %v1183_v5 = vmul.f32 %v1092_v36, %v954_v3  ;;  %v433_v6 = vsel %vm423_vm12, %v430_v45, %v432_v63  ;;  %v359_v46 = vsub.s32 4, %v1129_v18 }
  0x5e   :  { %v781_v48 = vadd.s32 4294967294, %v341_v59  ;;  %v1190_v8 = vsel %vm422_vm10, %v406_v39, %v409_v28  ;;  %v1192_v54 = vmul.u32 %v442_v41, %v439_v32  ;;  %v1196_v13 = vsel %vm424_vm11, %v412_v20, %v427_v58 }
  0x5f   :  { %v203_v53 = vsel %vm82_vm7, %v202_v21, %v201_v35  ;;  %v463_v15 = vand.u32 65535, %v433_v6  ;;  %v443_v16 = vmul.u32 %v441_v1, %v439_v32  ;;  %v1199_v17 = vmul.u32 %v441_v1, %v1141_v34 }
  0x60   :  { %v1175_v30 = vsel %vm1106_vm8, %v950_v0, %v203_v53  ;;  %vm782_vm15 = vcmp.lt.s32.totalorder %v781_v48, 0  ;;  %v464_v19 = vshrl.u32 %v433_v6, 16  ;;  %v447_v26 = vshll.u32 %v1192_v54, 16 }
  0x61   :  { %v208_v62 = vmul.f32 %v1175_v30, %v1175_v30  ;;  %v344_v24 = vsel %vm782_vm15, 0, %v781_v48  ;;  %vm230_vm0 = vcmp.eq.s32.totalorder %v1179_v4, 2  ;;  %v1209_v2 = vsel %vm237_vm13, %v359_v46, %v1129_v18 }
  0x62   :  { %v345_v28 = vsub.s32 32, %v344_v24  ;;  %v346_v20 = vshll.u32 %v1143_v38, %v344_v24  ;;  %v349_v35 = vsub.s32 4294967266, %v344_v24  ;;  %v446_v44 = vmul.u32 %v442_v41, %v1141_v34 }
  0x63   :  { %v209_v10 = vmul.f32 -0.001358992, %v208_v62  ;;  %v216_v12 = vmul.f32 -0.00019511016, %v208_v62  ;;  %v548_v21 = vand.u32 2139095040, %v1201_v23  ;;  %vm227_vm1 = vcmp.eq.s32.totalorder %v1179_v4, 0 }
  0x64   :  { %v347_v49 = vshrl.u32 %v329_v52, %v345_v28  ;;  %v350_v50 = vadd.s32 127, %v349_v35  ;;  %v465_v45 = vmul.u32 %v463_v15, %v439_v32  ;;  %v466_v63 = vmul.u32 %v464_v19, %v439_v32 }
  0x65   :  { %v210_v14 = vadd.f32 0.041655596, %v209_v10  ;;  %v217_v22 = vadd.f32 0.008332121, %v216_v12  ;;  %vm226_vm2 = vcmp.lt.s32.totalorder %v1179_v4, 2  ;;  %v449_v53 = vshll.u32 %v1199_v17, 16 }
  0x66   :  { %vm451_vm3 = vc.u32 %v443_v16, %v447_v26  ;;  %vm223_vm4 = vweird.f32 %v950_v0  ;;  %vm1219_vm5 = vcmp.le.f32.partialorder %v235_v9, 0.7853982  ;;  %v348_v57 = vor.u32 %v347_v49, %v346_v20 }
  0x67   :  { %v211_v39 = vmul.f32 %v210_v14, %v208_v62  ;;  %v218_v43 = vmul.f32 %v217_v22, %v208_v62  ;;  %v351_v52 = vshll.u32 %v350_v50, 23  ;;  %v452_v58 = vsel %vm451_vm3, 1, %v916_v42 }
  0x68   :  { %v467_v32 = vmul.u32 %v463_v15, %v1141_v34  ;;  %v453_v1 = vadd.s32 %v447_v26, %v443_v16  ;;  %v454_v41 = vadd.s32 %v452_v58, %v446_v44  ;;  %v355_v48 = vcvt.s32.f32 %v348_v57 }
  0x69   :  { %v212_v60 = vadd.f32 -0.4999988, %v211_v39  ;;  %v219_v38 = vadd.f32 -0.16666654, %v218_v43  ;;  %v352_v6 = vor.u32 4788187, %v351_v52  ;;  %v468_v14 = vmul.u32 %v464_v19, %v1141_v34 }
  0x6a   :  { %v448_v46 = vshrl.u32 %v1192_v54, 16  ;;  %v469_v10 = vshll.u32 %v466_v63, 16  ;;  %vm455_vm6 = vc.u32 %v453_v1, %v449_v53  ;;  %v450_v24 = vshrl.u32 %v1199_v17, 16 }
  0x6b   :  { %v213_v61 = vmul.f32 %v212_v60, %v208_v62  ;;  %v220_v59 = vmul.f32 %v219_v38, %v208_v62  ;;  %v353_v22 = vand.u32 2147483647, %v352_v6  ;;  %v456_v28 = vsel %vm455_vm6, 1, %v916_v42 }
  0x6c   :  { %v471_v15 = vshll.u32 %v467_v32, 16  ;;  %v458_v26 = vadd.s32 %v456_v28, %v454_v41  ;;  %vm473_vm7 = vc.u32 %v465_v45, %v469_v10  ;;  %v475_v35 = vadd.s32 %v469_v10, %v465_v45 }
  0x6d   :  { %v214_v12 = vadd.f32 1.0, %v213_v61  ;;  %v221_v9 = vadd.f32 1.0, %v220_v59  ;;  %v356_v20 = vmul.f32 %v355_v48, %v353_v22  ;;  %v474_v54 = vsel %vm473_vm7, 1, %v916_v42 }
  0x6e   :  { %v549_v39 = vshrl.u32 %v548_v21, 23  ;;  %v459_v19 = vadd.s32 %v458_v26, %v448_v46  ;;  %v476_v44 = vadd.s32 %v474_v54, %v468_v14  ;;  %v470_v49 = vshrl.u32 %v466_v63, 16 }
  0x6f   :  { %v222_v62 = vmul.f32 %v221_v9, %v1175_v30  ;;  %v231_v16 = vxor.u32 2147483648, %v214_v12  ;;  %v357_v17 = vxor.u32 2147483648, %v356_v20  ;;  %vm477_vm8 = vc.u32 %v475_v35, %v471_v15 }
  0x70   :  { %v786_v50 = vadd.s32 4294967169, %v549_v39  ;;  %v362_v60 = vsel %vm1219_vm5, 0, %v1209_v2  ;;  %v472_v38 = vshrl.u32 %v467_v32, 16  ;;  %v478_v21 = vsel %vm477_vm8, 1, %v916_v42 }
  0x71   :  { %v228_v43 = vxor.u32 2147483648, %v222_v62  ;;  %v232_v34 = vsel %vm230_vm0, %v231_v16, %v222_v62  ;;  %v358_v53 = vsel %vm237_vm13, %v357_v17, %v356_v20  ;;  %v480_v57 = vadd.s32 %v478_v21, %v476_v44 }
  0x72   :  { %v555_v63 = vadd.s32 1, %v786_v50  ;;  %v361_v58 = vsel %vm1219_vm5, %v954_v3, %v358_v53  ;;  %v1248_v61 = vadd.s32 %v459_v19, %v450_v24  ;;  %v1250_v2 = vadd.s32 %v475_v35, %v471_v15 }
  0x73   :  { %v229_v30 = vsel %vm227_vm1, %v214_v12, %v228_v43  ;;  %v363_v4 = vmul.f32 %v361_v58, %v361_v58  ;;  %v429_v59 = vsel %vm423_vm12, %v1190_v8, %v1196_v13  ;;  %v481_v1 = vadd.s32 %v480_v57, %v470_v49 }
  0x74   :  { %v233_v45 = vsel %vm226_vm2, %v229_v30, %v232_v34  ;;  %v1258_v0 = vperm.slane %v1090_v51, 1  ;;  %v379_v41 = vadd.s32 3, %v362_v60  ;;  %v545_v18 = vand.u32 2147483647, %v1201_v23 }
  0x75   :  { %v234_v52 = vsel %vm223_vm4, nan, %v233_v45  ;;  %vm556_vm9 = vcmp.gt.s32.totalorder %v555_v63, 0  ;;  %v364_v6 = vmul.f32 -0.001358992, %v363_v4  ;;  %v371_v48 = vmul.f32 -0.00019511016, %v363_v4 }
  0x76   :  { %v700_v32 = vadd.f32 %v234_v52, %v1133_v47  ;;  %v482_v46 = vadd.s32 %v481_v1, %v472_v38  ;;  %v557_v10 = vsel %vm556_vm9, %v555_v63, 0  ;;  %v483_v47 = vmul.u32 %v1115_v55, %v429_v59 }
  0x77   :  { %vm485_vm10 = vc.u32 %v1248_v61, %v1250_v2  ;;  %v559_v7 = vand.u32 31, %v557_v10  ;;  %v365_v8 = vadd.f32 0.041655596, %v364_v6  ;;  %v372_v13 = vadd.f32 0.008332121, %v371_v48 }
  0x78   :  { %704 = vst [vmem:[#allocation9] sm:$0xff] %v700_v32  ;;  %v486_v12 = vadd.s32 1, %v482_v46  ;;  %v1266_v9 = vmul.f32 %v1258_v0, %v1183_v5  ;;  %v380_v14 = vand.u32 3, %v379_v41  ;;  %v552_v55 = vand.u32 8388607, %v545_v18 }
  0x79   :  { %v1268_v22 = vsub.s32 32, %v559_v7  ;;  %v366_v24 = vmul.f32 %v365_v8, %v363_v4  ;;  %v373_v28 = vmul.f32 %v372_v13, %v363_v4  ;;  %v562_v16 = vshll.u32 %v910_v25, %v559_v7 }
  0x7a   :  { %v487_v15 = vsel %vm485_vm10, %v486_v12, %v482_v46  ;;  %v565_v26 = vshll.u32 %v911_v27, %v559_v7  ;;  %v568_v20 = vshll.u32 %v912_v29, %v559_v7  ;;  %v571_v39 = vshll.u32 %v913_v31, %v559_v7 }
  0x7b   :  { %v488_v62 = vadd.s32 %v487_v15, %v483_v47  ;;  %v367_v54 = vadd.f32 -0.4999988, %v366_v24  ;;  %v374_v35 = vadd.f32 -0.16666654, %v373_v28  ;;  %v563_v5 = vshrl.u32 %v911_v27, %v1268_v22 }
  0x7c   :  { %v566_v34 = vshrl.u32 %v912_v29, %v1268_v22  ;;  %v569_v19 = vshrl.u32 %v913_v31, %v1268_v22  ;;  %v572_v44 = vshrl.u32 %v914_v33, %v1268_v22  ;;  %v1284_v50 = vshrl.u32 %v557_v10, 5 }
  0x7d   :  { %v489_v43 = vadd.s32 536870912, %v488_v62  ;;  %v368_v17 = vmul.f32 %v367_v54, %v363_v4  ;;  %v375_v49 = vmul.f32 %v374_v35, %v363_v4  ;;  %v574_v30 = vshll.u32 %v914_v33, %v559_v7 }
  0x7e   :  { %vm378_vm11 = vweird.f32 %v954_v3  ;;  %vm385_vm12 = vcmp.eq.s32.totalorder %v380_v14, 2  ;;  %v575_v29 = vshrl.u32 %v915_v40, %v1268_v22  ;;  %v553_v31 = vor.u32 8388608, %v552_v55 }
  0x7f   :  { %v1288_v27 = vshrl.u32 %v489_v43, 30  ;;  %v369_v60 = vadd.f32 1.0, %v368_v17  ;;  %v376_v38 = vadd.f32 1.0, %v375_v49  ;;  %v1292_v21 = vor.u32 %v563_v5, %v562_v16 }
  0x80   :  { %v1295_v53 = vor.u32 %v566_v34, %v565_v26  ;;  %v1297_v57 = vor.u32 %v569_v19, %v568_v20  ;;  %v573_v33 = vor.u32 %v572_v44, %v571_v39  ;;  %v576_v32 = vor.u32 %v575_v29, %v574_v30 }
  0x81   :  { %v491_v45 = vshll.u32 %v1288_v27, 30  ;;  %v377_v63 = vmul.f32 %v376_v38, %v361_v58  ;;  %v386_v52 = vxor.u32 2147483648, %v369_v60  ;;  %vm580_vm13 = vcmp.lt.s32.totalorder %v1284_v50, 4 }
  0x82   :  { %vm381_vm14 = vcmp.lt.s32.totalorder %v380_v14, 2  ;;  %vm382_vm15 = vcmp.eq.s32.totalorder %v380_v14, 0  ;;  %vm577_vm0 = vcmp.lt.s32.totalorder %v1284_v50, 1  ;;  %vm579_vm1 = vcmp.lt.s32.totalorder %v1284_v50, 3 }
  0x83   :  { %v492_v40 = vsub.s32 %v488_v62, %v491_v45  ;;  %v383_v4 = vxor.u32 2147483648, %v377_v63  ;;  %v387_v59 = vsel %vm385_vm12, %v386_v52, %v377_v63  ;;  %v1303_v1 = vshll.u32 %v553_v31, 8 }
  0x84   :  { %vm578_vm3 = vcmp.lt.s32.totalorder %v1284_v50, 2  ;;  %v586_v58 = vsel %vm580_vm13, %v573_v33, 920167782  ;;  %v585_v48 = vsel %vm577_vm0, %v1292_v21, %v1295_v53  ;;  %v589_v46 = vsel %vm577_vm0, %v1295_v53, %v1297_v57 }
  0x85   :  { %vm493_vm2 = vcmp.lt.s32.totalorder %v492_v40, 0  ;;  %v494_v41 = vsub.s32 0, %v492_v40  ;;  %v384_v6 = vsel %vm382_vm15, %v369_v60, %v383_v4  ;;  %v590_v10 = vsel %vm580_vm13, %v576_v32, 1326507024 }
  0x86   :  { %v388_v47 = vsel %vm381_vm14, %v384_v6, %v387_v59  ;;  %v587_v8 = vsel %vm579_vm1, %v1297_v57, %v586_v58  ;;  %v591_v13 = vsel %vm579_vm1, %v573_v33, %v590_v10  ;;  %v594_v15 = vand.u32 65535, %v1303_v1 }
  0x87   :  { %v495_v7 = vsel %vm493_vm2, %v494_v41, %v492_v40  ;;  %v389_v12 = vsel %vm378_vm11, nan, %v388_v47  ;;  %v592_v28 = vsel %vm578_vm3, %v589_v46, %v591_v13  ;;  %v595_v55 = vshrl.u32 %v1303_v1, 16 }
  0x88   :  { %v496_v24 = vclz %v495_v7  ;;  %v701_v14 = vadd.f32 %v389_v12, %v1266_v9  ;;  %v596_v62 = vand.u32 65535, %v592_v28  ;;  %v597_v16 = vshrl.u32 %v592_v28, 16 }
  0x89   :  { %v588_v20 = vsel %vm578_vm3, %v585_v48, %v587_v8  ;;  %v484_v35 = vadd.s32 %v1250_v2, %v1248_v61  ;;  %v561_v38 = vshrl.u32 %v910_v25, %v1268_v22  ;;  %v582_v25 = vsel %vm580_vm13, %v1297_v57, 2102212464 }
  0x8a   :  { %v784_v26 = vadd.s32 4294967294, %v496_v24  ;;  %705 = vst [vmem:[#allocation9 + $0x8] sm:$0xff] %v701_v14  ;;  %v599_v54 = vmul.u32 %v597_v16, %v594_v15  ;;  %v600_v3 = vmul.u32 %v596_v62, %v595_v55  ;;  %v598_v5 = vmul.u32 %v596_v62, %v594_v15 }
  0x8b   :  { %v618_v34 = vand.u32 65535, %v588_v20  ;;  %v619_v9 = vshrl.u32 %v588_v20, 16  ;;  %v601_v49 = vmul.u32 %v597_v16, %v595_v55  ;;  %v581_v28 = vsel %vm577_vm0, %v561_v38, %v1292_v21 }
  0x8c   :  { %vm785_vm4 = vcmp.lt.s32.totalorder %v784_v26, 0  ;;  %v602_v43 = vshll.u32 %v599_v54, 16  ;;  %v604_v30 = vshll.u32 %v600_v3, 16  ;;  %v603_v4 = vshrl.u32 %v599_v54, 16 }
  0x8d   :  { %v499_v39 = vsel %vm785_vm4, 0, %v784_v26  ;;  %v620_v2 = vmul.u32 %v618_v34, %v594_v15  ;;  %v621_v45 = vmul.u32 %v619_v9, %v594_v15  ;;  %v622_v32 = vmul.u32 %v618_v34, %v595_v55 }
  0x8e   :  { %v500_v19 = vsub.s32 32, %v499_v39  ;;  %v501_v44 = vshll.u32 %v492_v40, %v499_v39  ;;  %v504_v17 = vsub.s32 4294967266, %v499_v39  ;;  %vm606_vm5 = vc.u32 %v598_v5, %v602_v43 }
  0x8f   :  { %v607_v31 = vsel %vm606_vm5, 1, %v916_v42  ;;  %v608_v61 = vadd.s32 %v602_v43, %v598_v5  ;;  %v623_v40 = vmul.u32 %v619_v9, %v595_v55  ;;  %v624_v59 = vshll.u32 %v621_v45, 16 }
  0x90   :  { %v502_v29 = vshrl.u32 %v484_v35, %v500_v19  ;;  %v505_v60 = vadd.s32 127, %v504_v17  ;;  %v609_v52 = vadd.s32 %v607_v31, %v601_v49  ;;  %v626_v48 = vshll.u32 %v622_v32, 16  ;;  %v810_v35 = vld [vmem:[#allocation6 + $0x10] sm:$0xff] }
  0x91   :  { %vm610_vm6 = vc.u32 %v608_v61, %v604_v30  ;;  %vm628_vm7 = vc.u32 %v620_v2, %v624_v59  ;;  %v630_v46 = vadd.s32 %v624_v59, %v620_v2  ;;  %v605_v47 = vshrl.u32 %v600_v3, 16 }
  0x92   :  { %v503_v33 = vor.u32 %v502_v29, %v501_v44  ;;  %v506_v63 = vshll.u32 %v505_v60, 23  ;;  %v611_v6 = vsel %vm610_vm6, 1, %v916_v42  ;;  %v629_v7 = vsel %vm628_vm7, 1, %v916_v42 }
  0x93   :  { %v613_v22 = vadd.s32 %v611_v6, %v609_v52  ;;  %v625_v13 = vshrl.u32 %v621_v45, 16  ;;  %v631_v12 = vadd.s32 %v629_v7, %v623_v40  ;;  %vm632_vm8 = vc.u32 %v630_v46, %v626_v48  ;;  %v811_v6 = vld [vmem:[#allocation6] sm:$0xff] }
  0x94   :  { %v507_v41 = vor.u32 4788187, %v506_v63  ;;  %v510_v58 = vcvt.s32.f32 %v503_v33  ;;  %v583_v57 = vsel %vm579_vm1, %v1295_v53, %v582_v25  ;;  %v633_v15 = vsel %vm632_vm8, 1, %v916_v42  ;;  %v812_v25 = vld [vmem:[#allocation6 + $0x8] sm:$0xff] }
  0x95   :  { %v614_v8 = vadd.s32 %v613_v22, %v603_v4  ;;  %vm392_vm9 = vcmp.lt.s32.totalorder %v960_v11, 0  ;;  %v514_v14 = vsub.s32 4, %v1288_v27  ;;  %v627_v55 = vshrl.u32 %v622_v32, 16 }
  0x96   :  { %v508_v10 = vand.u32 2147483647, %v507_v41  ;;  %v635_v62 = vadd.s32 %v633_v15, %v631_v12  ;;  %vm1354_vm10 = vcmp.le.f32.partialorder %v390_v56, 0.7853982  ;;  %v1360_v20 = vadd.s32 %v630_v46, %v626_v48 }
  0x97   :  { %v1358_v21 = vadd.s32 %v614_v8, %v605_v47  ;;  %v584_v42 = vsel %vm578_vm3, %v581_v28, %v583_v57  ;;  %v515_v3 = vsel %vm392_vm9, %v514_v14, %v1288_v27  ;;  %vm533_vm12 = vweird.f32 %v810_v35 }
  0x98   :  { %v511_v24 = vmul.f32 %v510_v58, %v508_v10  ;;  %v636_v53 = vadd.s32 %v635_v62, %v625_v13  ;;  %v638_v39 = vmul.u32 %v1303_v1, %v584_v42  ;;  %v517_v50 = vsel %vm1354_vm10, 0, %v515_v3 }
  0x99   :  { %vm640_vm11 = vc.u32 %v1358_v21, %v1360_v20  ;;  %v534_v49 = vadd.s32 3, %v517_v50  ;;  %v69_v1 = vmul.f32 %v810_v35, %v1092_v36  ;;  %v708_v48 = vmul.f32 %v811_v6, %v811_v6 }
  0x9a   :  { %v512_v26 = vxor.u32 2147483648, %v511_v24  ;;  %v637_v56 = vadd.s32 %v636_v53, %v627_v55  ;;  %v709_v22 = vmul.f32 %v812_v25, %v812_v25  ;;  %v710_v46 = vmul.f32 %v810_v35, %v810_v35 }
  0x9b   :  { %v535_v2 = vand.u32 3, %v534_v49  ;;  %v78_v52 = vmul.f32 %v1095_v37, %v69_v1  ;;  %v711_v10 = vmul.f32 %v1201_v23, %v1201_v23  ;;  %v712_v13 = vstv %s775_s2 }
  0x9c   :  { %v513_v54 = vsel %vm392_vm9, %v512_v26, %v511_v24  ;;  %v641_v43 = vadd.s32 1, %v637_v56  ;;  %v713_v24 = vmul.f32 %v712_v13, %v708_v48  ;;  %v714_v28 = vmul.f32 %v712_v13, %v709_v22 }
  0x9d   :  { %v516_v11 = vsel %vm1354_vm10, %v810_v35, %v513_v54  ;;  %vm536_vm13 = vcmp.lt.s32.totalorder %v535_v2, 2  ;;  %vm537_vm14 = vcmp.eq.s32.totalorder %v535_v2, 0  ;;  %vm540_vm15 = vcmp.eq.s32.totalorder %v535_v2, 2 }
  0x9e   :  { %v518_v5 = vmul.f32 %v516_v11, %v516_v11  ;;  %v642_v19 = vsel %vm640_vm11, %v641_v43, %v637_v56  ;;  %v715_v57 = vmul.f32 %v712_v13, %v710_v46  ;;  %v716_v14 = vmul.f32 %v712_v13, %v711_v10 }
  0x9f   :  { %v643_v17 = vadd.s32 %v642_v19, %v638_v39  ;;  %v717_v16 = vmul.f32 1.442695, %v713_v24  ;;  %v719_v26 = vmul.f32 1.442695, %v714_v28  ;;  %vm547_vm2 = vcmp.lt.s32.totalorder %v1201_v23, 0 }
  0xa0   :  { %v519_v34 = vmul.f32 -0.001358992, %v518_v5  ;;  %v526_v9 = vmul.f32 -0.00019511016, %v518_v5  ;;  %v721_v53 = vmul.f32 1.442695, %v715_v57  ;;  %vm688_vm7 = vweird.f32 %v1201_v23 }
  0xa1   :  { %v644_v60 = vadd.s32 536870912, %v643_v17  ;;  %v723_v54 = vmul.f32 1.442695, %v716_v14  ;;  %802 = vpow2.f32 %v717_v16  ;;  %vm546_vm3 = vcmp.le.f32.partialorder %v545_v18, 0.7853982 }
  0xa2   :  { %v520_v44 = vadd.f32 0.041655596, %v519_v34  ;;  %v527_v27 = vadd.f32 0.008332121, %v526_v9  ;;  %804 = vpow2.f32 %v719_v26 }
  0xa3   :  { %v1373_v61 = vshrl.u32 %v644_v60, 30  ;;  %806 = vpow2.f32 %v721_v53 }
  0xa4   :  { %v521_v30 = vmul.f32 %v520_v44, %v518_v5  ;;  %v528_v29 = vmul.f32 %v527_v27, %v518_v5  ;;  %808 = vpow2.f32 %v723_v54 }
  0xa5   :  { %v646_v63 = vshll.u32 %v1373_v61, 30 }
  0xa6   :  { %v522_v38 = vadd.f32 -0.4999988, %v521_v30  ;;  %v529_v31 = vadd.f32 -0.16666654, %v528_v29 }
  0xa7   :  { %v647_v40 = vsub.s32 %v643_v17, %v646_v63  ;;  %v803_v44 = vpop.eup %802  ;;  %v744_v17 = vstv %s776_s27 }
  0xa8   :  { %v523_v45 = vmul.f32 %v522_v38, %v518_v5  ;;  %v530_v33 = vmul.f32 %v529_v31, %v518_v5  ;;  %v734_v5 = vmul.f32 %v1090_v51, %v1090_v51  ;;  %v805_v49 = vpop.eup %804  ;;  %v725_v30 = vadd.f32 %v803_v44, %v1095_v37 }
  0xa9   :  { %vm648_vm0 = vcmp.lt.s32.totalorder %v647_v40, 0  ;;  %v649_v58 = vsub.s32 0, %v647_v40  ;;  %v807_v60 = vpop.eup %806  ;;  %v726_v31 = vadd.f32 %v805_v49, %v1258_v0 }
  0xaa   :  { %v524_v32 = vadd.f32 1.0, %v523_v45  ;;  %v531_v4 = vadd.f32 1.0, %v530_v33  ;;  %v736_v9 = vperm.slane %v734_v5, 0  ;;  %v737_v19 = vperm.slane %v734_v5, 1  ;;  %v809_v45 = vpop.eup %808  ;;  %730 = vst [vmem:[#allocation9 + $0x20] sm:$0xff] %v725_v30 }
  0xab   :  { %v650_v8 = vsel %vm648_vm0, %v649_v58, %v647_v40  ;;  %v727_v33 = vadd.f32 %v807_v60, %v1095_v37  ;;  %731 = vst [vmem:[#allocation9 + $0x28] sm:$0xff] %v726_v31  ;;  %v669_v58 = vsub.s32 4, %v1373_v61 }
  0xac   :  { %v532_v59 = vmul.f32 %v531_v4, %v516_v11  ;;  %v541_v41 = vxor.u32 2147483648, %v524_v32  ;;  %v651_v12 = vclz %v650_v8  ;;  %v639_v11 = vadd.s32 %v1360_v20, %v1358_v21 }
  0xad   :  { %v740_v20 = vadd.f32 %v736_v9, %v708_v48  ;;  %v741_v29 = vadd.f32 %v737_v19, %v709_v22  ;;  %v742_v51 = vadd.f32 %v736_v9, %v710_v46  ;;  %v743_v2 = vadd.f32 %v737_v19, %v711_v10  ;;  %732 = vst [vmem:[#allocation9 + $0x30] sm:$0xff] %v727_v33 }
  0xae   :  { %v538_v47 = vxor.u32 2147483648, %v532_v59  ;;  %v542_v7 = vsel %vm540_vm15, %v541_v41, %v532_v59  ;;  %v787_v62 = vadd.s32 4294967294, %v651_v12  ;;  %v670_v48 = vsel %vm547_vm2, %v669_v58, %v1373_v61 }
  0xaf   :  { %v745_v63 = vsub.f32 %v740_v20, %v744_v17  ;;  %v746_v4 = vsub.f32 %v741_v29, %v744_v17  ;;  %v748_v41 = vsub.f32 %v743_v2, %v744_v17  ;;  %v672_v46 = vsel %vm546_vm3, 0, %v670_v48 }
  0xb0   :  { %v539_v15 = vsel %vm537_vm14, %v524_v32, %v538_v47  ;;  %vm788_vm1 = vcmp.lt.s32.totalorder %v787_v62, 0  ;;  %v728_v32 = vadd.f32 %v809_v45, %v1258_v0  ;;  %v689_v13 = vadd.s32 3, %v672_v46 }
  0xb1   :  { %v543_v55 = vsel %vm536_vm13, %v539_v15, %v542_v7  ;;  %v654_v56 = vsel %vm788_vm1, 0, %v787_v62  ;;  %750 = vst [vmem:[#allocation9 + $0x40] sm:$0xff] %v745_v63  ;;  %v70_v61 = vmul.f32 %v1092_v36, %v1201_v23 }
  0xb2   :  { %v544_v42 = vsel %vm533_vm12, nan, %v543_v55  ;;  %v655_v39 = vsub.s32 32, %v654_v56  ;;  %v656_v43 = vshll.u32 %v647_v40, %v654_v56  ;;  %v659_v50 = vsub.s32 4294967266, %v654_v56  ;;  %733 = vst [vmem:[#allocation9 + $0x38] sm:$0xff] %v728_v32 }
  0xb3   :  { %v702_v3 = vadd.f32 %v544_v42, %v78_v52  ;;  %v747_v40 = vsub.f32 %v742_v51, %v744_v17  ;;  %751 = vst [vmem:[#allocation9 + $0x48] sm:$0xff] %v746_v4  ;;  %v690_v57 = vand.u32 3, %v689_v13  ;;  %v79_v54 = vmul.f32 %v1258_v0, %v70_v61 }
  0xb4   :  { %v657_v35 = vshrl.u32 %v639_v11, %v655_v39  ;;  %v660_v34 = vadd.s32 127, %v659_v50  ;;  %753 = vst [vmem:[#allocation9 + $0x58] sm:$0xff] %v748_v41 }
  0xb5   :  { %706 = vst [vmem:[#allocation9 + $0x10] sm:$0xff] %v702_v3  ;;  %vm695_vm4 = vcmp.eq.s32.totalorder %v690_v57, 2  ;;  %vm692_vm5 = vcmp.eq.s32.totalorder %v690_v57, 0  ;;  %vm691_vm6 = vcmp.lt.s32.totalorder %v690_v57, 2 }
  0xb6   :  { %v658_v27 = vor.u32 %v657_v35, %v656_v43  ;;  %v661_v21 = vshll.u32 %v660_v34, 23  ;;  %752 = vst [vmem:[#allocation9 + $0x50] sm:$0xff] %v747_v40 }
  0xb8   :  { %v662_v1 = vor.u32 4788187, %v661_v21  ;;  %v665_v38 = vcvt.s32.f32 %v658_v27 }
  0xba   :  { %v663_v52 = vand.u32 2147483647, %v662_v1 }
  0xbc   :  { %v666_v59 = vmul.f32 %v665_v38, %v663_v52 }
  0xbe   :  { %v667_v37 = vxor.u32 2147483648, %v666_v59 }
  0xc0   :  { %v668_v6 = vsel %vm547_vm2, %v667_v37, %v666_v59 }
  0xc1   :  { %v671_v25 = vsel %vm546_vm3, %v1201_v23, %v668_v6 }
  0xc2   :  { %v673_v22 = vmul.f32 %v671_v25, %v671_v25 }
  0xc4   :  { %v674_v10 = vmul.f32 -0.001358992, %v673_v22  ;;  %v681_v47 = vmul.f32 -0.00019511016, %v673_v22 }
  0xc6   :  { %v675_v7 = vadd.f32 0.041655596, %v674_v10  ;;  %v682_v8 = vadd.f32 0.008332121, %v681_v47 }
  0xc8   :  { %v676_v12 = vmul.f32 %v675_v7, %v673_v22  ;;  %v683_v24 = vmul.f32 %v682_v8, %v673_v22 }
  0xca   :  { %v677_v28 = vadd.f32 -0.4999988, %v676_v12  ;;  %v684_v18 = vadd.f32 -0.16666654, %v683_v24 }
  0xcc   :  { %v678_v15 = vmul.f32 %v677_v28, %v673_v22  ;;  %v685_v14 = vmul.f32 %v684_v18, %v673_v22 }
  0xce   :  { %v679_v55 = vadd.f32 1.0, %v678_v15  ;;  %v686_v62 = vadd.f32 1.0, %v685_v14 }
  0xd0   :  { %v687_v16 = vmul.f32 %v686_v62, %v671_v25  ;;  %v696_v26 = vxor.u32 2147483648, %v679_v55 }
  0xd2   :  { %v693_v42 = vxor.u32 2147483648, %v687_v16  ;;  %v697_v53 = vsel %vm695_vm4, %v696_v26, %v687_v16 }
  0xd4   :  { %v694_v3 = vsel %vm692_vm5, %v679_v55, %v693_v42 }
  0xd5   :  { %v698_v11 = vsel %vm691_vm6, %v694_v3, %v697_v53 }
  0xd6   :  { %v699_v36 = vsel %vm688_vm7, nan, %v698_v11 }
  0xd7   :  { %v703_v56 = vadd.f32 %v699_v36, %v79_v54 }
  0xd9   :  { %707 = vst [vmem:[#allocation9 + $0x18] sm:$0xff] %v703_v56 }
  0xda   :  { %766 = dma.vmem_to_hbm [thread:$0]  %s759_s29, 1536, %s761_s5, [#allocation4], %s907_s21, %s907_s21, %s908_s22  }
  0xdb   :  { %903 = dma.done.wait [#allocation4], 1536  }
  0xdc   :  { %904 = vsyncadd [#allocation4], 4294965760 }
  0xdd   :  { %771 = vsyncpa [#allocation3], 1 }
  0xde   :  { %772 = vsyncpa [#allocation8], 1 }
  0xdf   :  { %773 = vsyncpa [#allocation4], 1 }
  0xe0   :  { %774 = vsyncpa [#allocation5], 1 }

</bundles_post_ra>
